<compile_context>
chip_gen: v7x
topology: tpu7x:2x2x1
jax: 0.10.0
libtpu: 0.0.40
codegen_flags: <defaults>
</compile_context>

<pallas_src>
import functools

import jax
import jax.numpy as jnp
from jax import lax
from jax.experimental import pallas as pl
from jax.experimental.pallas import tpu as pltpu


# ---------------------------------------------------------------------------
# helpers: VMEM budgeting with (sublane, lane)-padded footprints
# ---------------------------------------------------------------------------
def _ceil_to(x, m):
    return -(-x // m) * m


def _phys_vmem_bytes():
    try:
        return int(pltpu.get_tpu_info().vmem_capacity_bytes)
    except Exception:          # conservative fallback = v7x per-core VMEM
        return 64 << 20


def _padded_block_bytes(shape, dtype):
    """VMEM footprint of one block, honouring (sublane, lane) tile padding."""
    isz = jnp.dtype(dtype).itemsize
    dims = [int(d) for d in shape]
    if not dims:
        return isz
    lane = _ceil_to(dims[-1], 128)
    if len(dims) == 1:
        return 8 * lane * isz
    sub_mult = 8 * max(1, 4 // isz)            # f32: 8, bf16: 16, int8: 32
    sub = _ceil_to(dims[-2], sub_mult)
    lead = 1
    for d in dims[:-2]:
        lead *= d
    return lead * sub * lane * isz


def _divisors_desc(n):
    return [d for d in range(n, 0, -1) if n % d == 0]


def _select_row_tile(ho, max_th, need_fn, budget):
    """Largest output-row tile that divides ho, is a multiple of 8 (or the
    full extent, to satisfy the (8,128) block rule) and fits the budget."""
    cands = [t for t in range(8, max_th + 1, 8) if ho % t == 0]
    if not cands or ho <= max_th:
        cands = cands + [ho]
    fitting = [t for t in cands if need_fn(t) <= budget]
    return max(fitting) if fitting else min(cands)


# ---------------------------------------------------------------------------
# conv branch:  F.pad(x, (0,1,0,1)) + Conv2d(C, C, kernel=3, stride=2)
# ---------------------------------------------------------------------------
def _conv_kernel(x_ref, xh_ref, w_ref, b_ref, o_ref, *, th, wo, tco):
    """One (batch, cout-tile, row-tile) grid step.

    x_ref : (1, th, 4C, Ws)      s2d rows [t*th, t*th + th)
    xh_ref: (1, 1, 4C, Ws)       halo row t*th + th (same array, 2nd BlockSpec)
    w_ref : (1, 2, 2*tco, 4C)    [prev | nxt] taps; rows [0,tco) = bw=0 taps,
                                 rows [tco,2*tco) = bw=1 taps (M-stacked)
    b_ref : (tco, 1)             f32 bias
    o_ref : (1, tco, th, wo)     NCHW output tile (W on lanes)
    """
    w_prev = w_ref[0, 0]                               # (2*tco, 4C)
    w_nxt = w_ref[0, 1]
    b = b_ref[...]                                     # (tco, 1)

    # TODO(synk): batch the th row-stores into one dense (tco, th, wo) store
    # (needs an in-kernel co<->row interleave); per-row stores are masked.
    for r in range(th):                                # static unroll, th <= 16
        prev = x_ref[0, r]                             # (4C, Ws) contiguous slab
        nxt = x_ref[0, r + 1] if r + 1 < th else xh_ref[0, 0]
        # Two M-stacked MXU dots per row (was four): both bw groups at once.
        acc = jnp.dot(w_prev, prev, preferred_element_type=jnp.float32)
        acc = acc + jnp.dot(w_nxt, nxt, preferred_element_type=jnp.float32)
        # bw=1 taps read the next s2d column -> take result columns 1..wo.
        # TODO(synk): keep the dot N at wo (drop the zero s2d column) and do
        # this shift with an XLU roll to avoid an extra lane tile at wo%128==0.
        row = acc[:tco, :wo] + acc[tco:, 1:wo + 1] + b
        o_ref[0, :, r, :] = row.astype(o_ref.dtype)


def _downsample_conv(x, weight, bias, compute_dtype):
    n, c, h, w = x.shape
    ho, wo = h // 2, w // 2
    hs, ws = ho + 1, wo + 1
    cpack = 4 * c
    # bf16 MXU operands by default (f32 accumulation); pass jnp.float32 for
    # bit-strict results.
    cdt = jnp.dtype(jnp.bfloat16) if compute_dtype is None else jnp.dtype(compute_dtype)
    out_dtype = x.dtype

    # --- glue: one fused pad + space-to-depth relayout -> (N, Hs, 4C, Ws) ----
    # packed channel p = (di*2 + dj)*C + ci ; s2d position (hs, ws) holds the
    # original pixel (2*hs + di, 2*ws + dj).  Pad by 2 (1 from F.pad plus one
    # structural zero row/col that only ever meets zero weights).
    # TODO(synk): fold this relayout into the kernel (manual strided DMA) to
    # drop the extra HBM pass over x.
    xp = jnp.pad(x, ((0, 0), (0, 0), (0, 2), (0, 2)))
    x_s2d = (
        xp.reshape(n, c, hs, 2, ws, 2)
        .transpose(0, 2, 3, 5, 1, 4)                    # (n, hs, di, dj, ci, ws)
        .reshape(n, hs, cpack, ws)
        .astype(cdt)
    )

    # --- tiling (padded footprints, physical-VMEM clamp) ---------------------
    phys = _phys_vmem_bytes()
    budget = max(phys - (12 << 20), 16 << 20)

    def w_block_bytes(t):
        return (_padded_block_bytes((1, 2, 2 * t, cpack), cdt)
                + _padded_block_bytes((t, 1), jnp.float32))

    if c % 256 == 0 and 2 * w_block_bytes(256) <= budget // 3:
        tco = 256
    elif c % 128 == 0:
        tco = 128
    else:
        tco = c
    n_co = c // tco

    def need(t):
        in_b = _padded_block_bytes((1, t, cpack, ws), cdt)
        halo_b = _padded_block_bytes((1, 1, cpack, ws), cdt)
        out_b = _padded_block_bytes((1, tco, t, wo), out_dtype)
        # x2 = BlockSpec double buffering; weights counted x2 as well.
        return 2 * (in_b + halo_b + out_b) + 2 * w_block_bytes(tco) + (2 << 20)

    max_th = min(16, ho)
    if n * n_co == 1 and ho >= 2:
        # keep >=2 iterations on a parallel axis so v7x can use both TensorCores
        max_th = max(1, min(max_th, ho // 2))
    th = _select_row_tile(ho, max_th, need, budget)
    n_h = ho // th
    vmem_limit = int(max(32 << 20, min(phys - (4 << 20), need(th) + (8 << 20))))

    # --- weights: (C, C, 3, 3) -> (n_co, 2, 2*tco, 4C) -----------------------
    # axis 1: 0 -> taps for s2d row t ("prev", bh=0), 1 -> row t+1 ("nxt").
    # axis 2: rows [0, tco) = bw=0 taps, rows [tco, 2*tco) = bw=1 taps.
    wp = jnp.pad(weight, ((0, 0), (0, 0), (0, 1), (0, 1)))      # (C, C, 4, 4)
    w_taps = (
        wp.reshape(c, c, 2, 2, 2, 2)                    # (co, ci, bh, di, bw, dj)
        .transpose(2, 4, 0, 3, 5, 1)                    # (bh, bw, co, di, dj, ci)
        .reshape(2, 2, c, cpack)
    )
    w_m = (
        w_taps.reshape(2, 2, n_co, tco, cpack)
        .transpose(2, 0, 1, 3, 4)                       # (n_co, bh, bw, tco, 4C)
        .reshape(n_co, 2, 2 * tco, cpack)
        .astype(cdt)
    )
    b2 = bias.reshape(c, 1).astype(jnp.float32)

    kernel = functools.partial(_conv_kernel, th=th, wo=wo, tco=tco)
    return pl.pallas_call(
        kernel,
        out_shape=jax.ShapeDtypeStruct((n, c, ho, wo), out_dtype),
        grid_spec=pltpu.PrefetchScalarGridSpec(
            num_scalar_prefetch=0,
            grid=(n, n_co, n_h),
            in_specs=[
                # main row tile of the s2d input
                pl.BlockSpec((1, th, cpack, ws), lambda b, co, t: (b, t, 0, 0)),
                # one-row halo of the SAME array (s2d row t*th + th)
                pl.BlockSpec((1, 1, cpack, ws),
                             lambda b, co, t: (b, t * th + th, 0, 0)),
                pl.BlockSpec((1, 2, 2 * tco, cpack),
                             lambda b, co, t: (co, 0, 0, 0)),
                pl.BlockSpec((tco, 1), lambda b, co, t: (co, 0)),
            ],
            out_specs=pl.BlockSpec((1, tco, th, wo),
                                   lambda b, co, t: (b, co, t, 0)),
        ),
        compiler_params=pltpu.CompilerParams(
            dimension_semantics=("parallel", "parallel", "parallel"),
            vmem_limit_bytes=vmem_limit,
        ),
    )(x_s2d, x_s2d, w_m, b2)


# ---------------------------------------------------------------------------
# pool branch: avg_pool2d(kernel=2, stride=2)  -- pure VPU, single dense store
# ---------------------------------------------------------------------------
def _pool_kernel(x_ref, o_ref):
    """x_ref: (1, cb, 2, 2, th, wo) -> o_ref: (1, cb, th, wo).
    Fully vectorized: 3 adds + 1 mul, one unmasked full-block store."""
    s = (x_ref[0, :, 0, 0] + x_ref[0, :, 0, 1]
         + x_ref[0, :, 1, 0] + x_ref[0, :, 1, 1])
    o_ref[0] = (s * 0.25).astype(o_ref.dtype)


def _downsample_pool(x):
    n, c, h, w = x.shape
    ho, wo = h // 2, w // 2

    # glue: single space-to-depth relayout -> (N, C, 2, 2, ho, wo)
    # TODO(synk): read NCHW directly (in-kernel strided deinterleave) to drop
    # this extra HBM pass; the pool branch is HBM-bound.
    xp = (x.reshape(n, c, ho, 2, wo, 2)
          .transpose(0, 1, 3, 5, 2, 4))

    phys = _phys_vmem_bytes()
    budget = max(phys - (12 << 20), 16 << 20)

    max_th = min(64, ho)
    if n == 1 and ho >= 2:
        max_th = max(1, min(max_th, ho // 2))

    def _need(cb, t):
        in_b = _padded_block_bytes((1, cb, 2, 2, t, wo), x.dtype)
        out_b = _padded_block_bytes((1, cb, t, wo), x.dtype)
        return 2 * (in_b + out_b) + (2 << 20)

    cblk, th = c, ho
    for cb in _divisors_desc(c):
        t_sel = _select_row_tile(ho, max_th, lambda t: _need(cb, t), budget)
        cblk, th = cb, t_sel
        if _need(cb, t_sel) <= budget:
            break
    n_cb, n_h = c // cblk, ho // th
    vmem_limit = int(max(32 << 20,
                         min(phys - (4 << 20), _need(cblk, th) + (8 << 20))))

    return pl.pallas_call(
        _pool_kernel,
        out_shape=jax.ShapeDtypeStruct((n, c, ho, wo), x.dtype),
        grid_spec=pltpu.PrefetchScalarGridSpec(
            num_scalar_prefetch=0,
            grid=(n, n_cb, n_h),
            in_specs=[pl.BlockSpec((1, cblk, 2, 2, th, wo),
                                   lambda b, cg, t: (b, cg, 0, 0, t, 0))],
            out_specs=pl.BlockSpec((1, cblk, th, wo),
                                   lambda b, cg, t: (b, cg, t, 0)),
        ),
        compiler_params=pltpu.CompilerParams(
            dimension_semantics=("parallel", "parallel", "parallel"),
            vmem_limit_bytes=vmem_limit,
        ),
    )(xp)


# ---------------------------------------------------------------------------
# public wrapper (matches Downsample.forward)
# ---------------------------------------------------------------------------
def downsample(x, weight=None, bias=None, *, with_conv=True, compute_dtype=None):
    """x: (N, C, H, W) with even H, W.  Returns (N, C, H//2, W//2) in NCHW."""
    n, c, h, w = x.shape
    # TODO(synk): odd H/W (legal for the PyTorch conv branch) is not handled by
    # the space-to-depth tiling; VAE usage always has even spatial dims.
    assert h % 2 == 0 and w % 2 == 0, "Downsample kernel assumes even H, W"
    if with_conv:
        assert weight is not None and bias is not None
        assert weight.shape == (c, c, 3, 3)
        return _downsample_conv(x, weight, bias, compute_dtype)
    return _downsample_pool(x)


# ---------------------------------------------------------------------------
# pure-JAX reference + self-test
# ---------------------------------------------------------------------------
def _ref_downsample(x, weight, bias, with_conv):
    n, c, h, w = x.shape
    if with_conv:
        x_pad = jnp.pad(x, ((0, 0), (0, 0), (0, 1), (0, 1)))
        y = lax.conv_general_dilated(
            x_pad, weight, window_strides=(2, 2), padding="VALID",
            dimension_numbers=("NCHW", "OIHW", "NCHW"))
        return y + bias[None, :, None, None]
    return x.reshape(n, c, h // 2, 2, w // 2, 2).mean(axis=(3, 5))


if __name__ == "__main__":
    key = jax.random.PRNGKey(0)
    kx, kw, kb, kx2, kw2, kb2 = jax.random.split(key, 6)

    # ---- small shape: strict f32 check, default-bf16 check, pool branch ----
    N, C, H, W = 2, 4, 16, 16
    x = jax.random.normal(kx, (N, C, H, W), jnp.float32)
    fan_in = C * 3 * 3
    bound = 1.0 / (fan_in ** 0.5)
    weight = jax.random.uniform(kw, (C, C, 3, 3), jnp.float32, -bound, bound)
    bias = jax.random.uniform(kb, (C,), jnp.float32, -bound, bound)

    y_ref = _ref_downsample(x, weight, bias, True)

    y_f32 = jax.block_until_ready(
        downsample(x, weight, bias, with_conv=True, compute_dtype=jnp.float32))
    assert y_f32.shape == (N, C, H // 2, W // 2)
    assert jnp.allclose(y_f32, y_ref, atol=1e-5, rtol=1e-5)

    # default path: bf16 MXU operands, f32 accumulation
    y_bf16 = jax.block_until_ready(downsample(x, weight, bias, with_conv=True))
    assert jnp.allclose(y_bf16, y_ref, atol=5e-2, rtol=5e-2)

    # with_conv=False branch (avg_pool2d)
    y_pool = jax.block_until_ready(downsample(x, with_conv=False))
    y_pool_ref = _ref_downsample(x, None, None, False)
    assert y_pool.shape == (N, C, H // 2, W // 2)
    assert jnp.allclose(y_pool, y_pool_ref, atol=1e-5, rtol=1e-5)

    # ---- medium shape: exercises tco=128, multi row tiles, halo at last tile
    N2, C2, H2, W2 = 1, 128, 32, 32
    x2 = jax.random.normal(kx2, (N2, C2, H2, W2), jnp.float32)
    fan_in2 = C2 * 3 * 3
    bound2 = 1.0 / (fan_in2 ** 0.5)
    weight2 = jax.random.uniform(kw2, (C2, C2, 3, 3), jnp.float32, -bound2, bound2)
    bias2 = jax.random.uniform(kb2, (C2,), jnp.float32, -bound2, bound2)

    y2_ref = _ref_downsample(x2, weight2, bias2, True)
    y2 = jax.block_until_ready(downsample(x2, weight2, bias2, with_conv=True))
    assert y2.shape == (N2, C2, H2 // 2, W2 // 2)
    assert jnp.allclose(y2, y2_ref, atol=5e-2, rtol=5e-2)

    print("KERNEL_OK")
</pallas_src>

<mosaic_0001>
module attributes {stable_mosaic.version = 11 : i64} {
  func.func @_conv_kernel(%arg0: i32, %arg1: i32, %arg2: i32, %arg3: memref<1x8x16x9xf32, #tpu.memory_space<vmem>>, %arg4: memref<1x1x16x9xf32, #tpu.memory_space<vmem>>, %arg5: memref<1x2x8x16xf32, #tpu.memory_space<vmem>>, %arg6: memref<4x1xf32, #tpu.memory_space<vmem>>, %arg7: memref<1x4x8x8xf32, #tpu.memory_space<vmem>>) attributes {dimension_semantics = [#tpu.dimension_semantics<parallel>, #tpu.dimension_semantics<parallel>, #tpu.dimension_semantics<parallel>], iteration_bounds = array<i64: 2, 1, 1>, scalar_prefetch = 0 : i64, scratch_operands = 0 : i64, tpu.core_type = #tpu.core_type<tc>, window_params = [{transform_indices = @transform_0, window_bounds = array<i64: 1, 8, 16, 9>}, {transform_indices = @transform_1, window_bounds = array<i64: 1, 1, 16, 9>}, {transform_indices = @transform_2, window_bounds = array<i64: 1, 2, 8, 16>}, {transform_indices = @transform_3, window_bounds = array<i64: 4, 1>}, {transform_indices = @transform_4, window_bounds = array<i64: 1, 4, 8, 8>}]} {
    %c0 = arith.constant 0 : index
    %c0_0 = arith.constant 0 : index
    %c0_1 = arith.constant 0 : index
    %c0_2 = arith.constant 0 : index
    %0 = vector.load %arg5[%c0, %c0_0, %c0_1, %c0_2] : memref<1x2x8x16xf32, #tpu.memory_space<vmem>>, vector<1x1x8x16xf32>
    %1 = vector.shape_cast %0 : vector<1x1x8x16xf32> to vector<8x16xf32>
    %c0_3 = arith.constant 0 : index
    %c1 = arith.constant 1 : index
    %c0_4 = arith.constant 0 : index
    %c0_5 = arith.constant 0 : index
    %2 = vector.load %arg5[%c0_3, %c1, %c0_4, %c0_5] : memref<1x2x8x16xf32, #tpu.memory_space<vmem>>, vector<1x1x8x16xf32>
    %3 = vector.shape_cast %2 : vector<1x1x8x16xf32> to vector<8x16xf32>
    %c0_6 = arith.constant 0 : index
    %c0_7 = arith.constant 0 : index
    %4 = vector.load %arg6[%c0_6, %c0_7] : memref<4x1xf32, #tpu.memory_space<vmem>>, vector<4x1xf32>
    %c0_8 = arith.constant 0 : index
    %c0_9 = arith.constant 0 : index
    %c0_10 = arith.constant 0 : index
    %c0_11 = arith.constant 0 : index
    %5 = vector.load %arg3[%c0_8, %c0_9, %c0_10, %c0_11] : memref<1x8x16x9xf32, #tpu.memory_space<vmem>>, vector<1x1x16x9xf32>
    %6 = vector.shape_cast %5 : vector<1x1x16x9xf32> to vector<16x9xf32>
    %c0_12 = arith.constant 0 : index
    %c1_13 = arith.constant 1 : index
    %c0_14 = arith.constant 0 : index
    %c0_15 = arith.constant 0 : index
    %7 = vector.load %arg3[%c0_12, %c1_13, %c0_14, %c0_15] : memref<1x8x16x9xf32, #tpu.memory_space<vmem>>, vector<1x1x16x9xf32>
    %8 = vector.shape_cast %7 : vector<1x1x16x9xf32> to vector<16x9xf32>
    %cst = arith.constant dense<0.000000e+00> : vector<8x9xf32>
    %9 = tpu.matmul %1, %6, %cst {dimension_numbers = #tpu.dot_dimension_numbers<[1], [0], [0], [1], [0, 0, 1, 1], [], []>} : vector<8x16xf32>, vector<16x9xf32>, vector<8x9xf32> -> vector<8x9xf32>
    %cst_16 = arith.constant dense<0.000000e+00> : vector<8x9xf32>
    %10 = tpu.matmul %3, %8, %cst_16 {dimension_numbers = #tpu.dot_dimension_numbers<[1], [0], [0], [1], [0, 0, 1, 1], [], []>} : vector<8x16xf32>, vector<16x9xf32>, vector<8x9xf32> -> vector<8x9xf32>
    %11 = arith.addf %9, %10 : vector<8x9xf32>
    %12 = vector.extract_strided_slice %11 {offsets = [0, 0], sizes = [4, 8], strides = [1, 1]} : vector<8x9xf32> to vector<4x8xf32>
    %13 = vector.extract_strided_slice %11 {offsets = [4, 1], sizes = [4, 8], strides = [1, 1]} : vector<8x9xf32> to vector<4x8xf32>
    %14 = arith.addf %12, %13 : vector<4x8xf32>
    %15 = vector.broadcast %4 : vector<4x1xf32> to vector<4x8xf32>
    %16 = arith.addf %14, %15 : vector<4x8xf32>
    %c0_17 = arith.constant 0 : index
    %c0_18 = arith.constant 0 : index
    %c0_19 = arith.constant 0 : index
    %c0_20 = arith.constant 0 : index
    %17 = vector.load %arg7[%c0_17, %c0_18, %c0_19, %c0_20] : memref<1x4x8x8xf32, #tpu.memory_space<vmem>>, vector<1x4x1x8xf32>
    %18 = vector.shape_cast %17 : vector<1x4x1x8xf32> to vector<4x8xf32>
    %19 = vector.shape_cast %16 : vector<4x8xf32> to vector<1x4x1x8xf32>
    tpu.vector_store %arg7[%c0_17, %c0_18, %c0_19, %c0_20], %19 {strides = array<i32>} : memref<1x4x8x8xf32, #tpu.memory_space<vmem>>, vector<1x4x1x8xf32>,
    %c0_21 = arith.constant 0 : index
    %c1_22 = arith.constant 1 : index
    %c0_23 = arith.constant 0 : index
    %c0_24 = arith.constant 0 : index
    %20 = vector.load %arg3[%c0_21, %c1_22, %c0_23, %c0_24] : memref<1x8x16x9xf32, #tpu.memory_space<vmem>>, vector<1x1x16x9xf32>
    %21 = vector.shape_cast %20 : vector<1x1x16x9xf32> to vector<16x9xf32>
    %c0_25 = arith.constant 0 : index
    %c2 = arith.constant 2 : index
    %c0_26 = arith.constant 0 : index
    %c0_27 = arith.constant 0 : index
    %22 = vector.load %arg3[%c0_25, %c2, %c0_26, %c0_27] : memref<1x8x16x9xf32, #tpu.memory_space<vmem>>, vector<1x1x16x9xf32>
    %23 = vector.shape_cast %22 : vector<1x1x16x9xf32> to vector<16x9xf32>
    %cst_28 = arith.constant dense<0.000000e+00> : vector<8x9xf32>
    %24 = tpu.matmul %1, %21, %cst_28 {dimension_numbers = #tpu.dot_dimension_numbers<[1], [0], [0], [1], [0, 0, 1, 1], [], []>} : vector<8x16xf32>, vector<16x9xf32>, vector<8x9xf32> -> vector<8x9xf32>
    %cst_29 = arith.constant dense<0.000000e+00> : vector<8x9xf32>
    %25 = tpu.matmul %3, %23, %cst_29 {dimension_numbers = #tpu.dot_dimension_numbers<[1], [0], [0], [1], [0, 0, 1, 1], [], []>} : vector<8x16xf32>, vector<16x9xf32>, vector<8x9xf32> -> vector<8x9xf32>
    %26 = arith.addf %24, %25 : vector<8x9xf32>
    %27 = vector.extract_strided_slice %26 {offsets = [0, 0], sizes = [4, 8], strides = [1, 1]} : vector<8x9xf32> to vector<4x8xf32>
    %28 = vector.extract_strided_slice %26 {offsets = [4, 1], sizes = [4, 8], strides = [1, 1]} : vector<8x9xf32> to vector<4x8xf32>
    %29 = arith.addf %27, %28 : vector<4x8xf32>
    %30 = vector.broadcast %4 : vector<4x1xf32> to vector<4x8xf32>
    %31 = arith.addf %29, %30 : vector<4x8xf32>
    %c0_30 = arith.constant 0 : index
    %c0_31 = arith.constant 0 : index
    %c1_32 = arith.constant 1 : index
    %c0_33 = arith.constant 0 : index
    %32 = vector.load %arg7[%c0_30, %c0_31, %c1_32, %c0_33] : memref<1x4x8x8xf32, #tpu.memory_space<vmem>>, vector<1x4x1x8xf32>
    %33 = vector.shape_cast %32 : vector<1x4x1x8xf32> to vector<4x8xf32>
    %34 = vector.shape_cast %31 : vector<4x8xf32> to vector<1x4x1x8xf32>
    tpu.vector_store %arg7[%c0_30, %c0_31, %c1_32, %c0_33], %34 {strides = array<i32>} : memref<1x4x8x8xf32, #tpu.memory_space<vmem>>, vector<1x4x1x8xf32>,
    %c0_34 = arith.constant 0 : index
    %c2_35 = arith.constant 2 : index
    %c0_36 = arith.constant 0 : index
    %c0_37 = arith.constant 0 : index
    %35 = vector.load %arg3[%c0_34, %c2_35, %c0_36, %c0_37] : memref<1x8x16x9xf32, #tpu.memory_space<vmem>>, vector<1x1x16x9xf32>
    %36 = vector.shape_cast %35 : vector<1x1x16x9xf32> to vector<16x9xf32>
    %c0_38 = arith.constant 0 : index
    %c3 = arith.constant 3 : index
    %c0_39 = arith.constant 0 : index
    %c0_40 = arith.constant 0 : index
    %37 = vector.load %arg3[%c0_38, %c3, %c0_39, %c0_40] : memref<1x8x16x9xf32, #tpu.memory_space<vmem>>, vector<1x1x16x9xf32>
    %38 = vector.shape_cast %37 : vector<1x1x16x9xf32> to vector<16x9xf32>
    %cst_41 = arith.constant dense<0.000000e+00> : vector<8x9xf32>
    %39 = tpu.matmul %1, %36, %cst_41 {dimension_numbers = #tpu.dot_dimension_numbers<[1], [0], [0], [1], [0, 0, 1, 1], [], []>} : vector<8x16xf32>, vector<16x9xf32>, vector<8x9xf32> -> vector<8x9xf32>
    %cst_42 = arith.constant dense<0.000000e+00> : vector<8x9xf32>
    %40 = tpu.matmul %3, %38, %cst_42 {dimension_numbers = #tpu.dot_dimension_numbers<[1], [0], [0], [1], [0, 0, 1, 1], [], []>} : vector<8x16xf32>, vector<16x9xf32>, vector<8x9xf32> -> vector<8x9xf32>
    %41 = arith.addf %39, %40 : vector<8x9xf32>
    %42 = vector.extract_strided_slice %41 {offsets = [0, 0], sizes = [4, 8], strides = [1, 1]} : vector<8x9xf32> to vector<4x8xf32>
    %43 = vector.extract_strided_slice %41 {offsets = [4, 1], sizes = [4, 8], strides = [1, 1]} : vector<8x9xf32> to vector<4x8xf32>
    %44 = arith.addf %42, %43 : vector<4x8xf32>
    %45 = vector.broadcast %4 : vector<4x1xf32> to vector<4x8xf32>
    %46 = arith.addf %44, %45 : vector<4x8xf32>
    %c0_43 = arith.constant 0 : index
    %c0_44 = arith.constant 0 : index
    %c2_45 = arith.constant 2 : index
    %c0_46 = arith.constant 0 : index
    %47 = vector.load %arg7[%c0_43, %c0_44, %c2_45, %c0_46] : memref<1x4x8x8xf32, #tpu.memory_space<vmem>>, vector<1x4x1x8xf32>
    %48 = vector.shape_cast %47 : vector<1x4x1x8xf32> to vector<4x8xf32>
    %49 = vector.shape_cast %46 : vector<4x8xf32> to vector<1x4x1x8xf32>
    tpu.vector_store %arg7[%c0_43, %c0_44, %c2_45, %c0_46], %49 {strides = array<i32>} : memref<1x4x8x8xf32, #tpu.memory_space<vmem>>, vector<1x4x1x8xf32>,
    %c0_47 = arith.constant 0 : index
    %c3_48 = arith.constant 3 : index
    %c0_49 = arith.constant 0 : index
    %c0_50 = arith.constant 0 : index
    %50 = vector.load %arg3[%c0_47, %c3_48, %c0_49, %c0_50] : memref<1x8x16x9xf32, #tpu.memory_space<vmem>>, vector<1x1x16x9xf32>
    %51 = vector.shape_cast %50 : vector<1x1x16x9xf32> to vector<16x9xf32>
    %c0_51 = arith.constant 0 : index
    %c4 = arith.constant 4 : index
    %c0_52 = arith.constant 0 : index
    %c0_53 = arith.constant 0 : index
    %52 = vector.load %arg3[%c0_51, %c4, %c0_52, %c0_53] : memref<1x8x16x9xf32, #tpu.memory_space<vmem>>, vector<1x1x16x9xf32>
    %53 = vector.shape_cast %52 : vector<1x1x16x9xf32> to vector<16x9xf32>
    %cst_54 = arith.constant dense<0.000000e+00> : vector<8x9xf32>
    %54 = tpu.matmul %1, %51, %cst_54 {dimension_numbers = #tpu.dot_dimension_numbers<[1], [0], [0], [1], [0, 0, 1, 1], [], []>} : vector<8x16xf32>, vector<16x9xf32>, vector<8x9xf32> -> vector<8x9xf32>
    %cst_55 = arith.constant dense<0.000000e+00> : vector<8x9xf32>
    %55 = tpu.matmul %3, %53, %cst_55 {dimension_numbers = #tpu.dot_dimension_numbers<[1], [0], [0], [1], [0, 0, 1, 1], [], []>} : vector<8x16xf32>, vector<16x9xf32>, vector<8x9xf32> -> vector<8x9xf32>
    %56 = arith.addf %54, %55 : vector<8x9xf32>
    %57 = vector.extract_strided_slice %56 {offsets = [0, 0], sizes = [4, 8], strides = [1, 1]} : vector<8x9xf32> to vector<4x8xf32>
    %58 = vector.extract_strided_slice %56 {offsets = [4, 1], sizes = [4, 8], strides = [1, 1]} : vector<8x9xf32> to vector<4x8xf32>
    %59 = arith.addf %57, %58 : vector<4x8xf32>
    %60 = vector.broadcast %4 : vector<4x1xf32> to vector<4x8xf32>
    %61 = arith.addf %59, %60 : vector<4x8xf32>
    %c0_56 = arith.constant 0 : index
    %c0_57 = arith.constant 0 : index
    %c3_58 = arith.constant 3 : index
    %c0_59 = arith.constant 0 : index
    %62 = vector.load %arg7[%c0_56, %c0_57, %c3_58, %c0_59] : memref<1x4x8x8xf32, #tpu.memory_space<vmem>>, vector<1x4x1x8xf32>
    %63 = vector.shape_cast %62 : vector<1x4x1x8xf32> to vector<4x8xf32>
    %64 = vector.shape_cast %61 : vector<4x8xf32> to vector<1x4x1x8xf32>
    tpu.vector_store %arg7[%c0_56, %c0_57, %c3_58, %c0_59], %64 {strides = array<i32>} : memref<1x4x8x8xf32, #tpu.memory_space<vmem>>, vector<1x4x1x8xf32>,
    %c0_60 = arith.constant 0 : index
    %c4_61 = arith.constant 4 : index
    %c0_62 = arith.constant 0 : index
    %c0_63 = arith.constant 0 : index
    %65 = vector.load %arg3[%c0_60, %c4_61, %c0_62, %c0_63] : memref<1x8x16x9xf32, #tpu.memory_space<vmem>>, vector<1x1x16x9xf32>
    %66 = vector.shape_cast %65 : vector<1x1x16x9xf32> to vector<16x9xf32>
    %c0_64 = arith.constant 0 : index
    %c5 = arith.constant 5 : index
    %c0_65 = arith.constant 0 : index
    %c0_66 = arith.constant 0 : index
    %67 = vector.load %arg3[%c0_64, %c5, %c0_65, %c0_66] : memref<1x8x16x9xf32, #tpu.memory_space<vmem>>, vector<1x1x16x9xf32>
    %68 = vector.shape_cast %67 : vector<1x1x16x9xf32> to vector<16x9xf32>
    %cst_67 = arith.constant dense<0.000000e+00> : vector<8x9xf32>
    %69 = tpu.matmul %1, %66, %cst_67 {dimension_numbers = #tpu.dot_dimension_numbers<[1], [0], [0], [1], [0, 0, 1, 1], [], []>} : vector<8x16xf32>, vector<16x9xf32>, vector<8x9xf32> -> vector<8x9xf32>
    %cst_68 = arith.constant dense<0.000000e+00> : vector<8x9xf32>
    %70 = tpu.matmul %3, %68, %cst_68 {dimension_numbers = #tpu.dot_dimension_numbers<[1], [0], [0], [1], [0, 0, 1, 1], [], []>} : vector<8x16xf32>, vector<16x9xf32>, vector<8x9xf32> -> vector<8x9xf32>
    %71 = arith.addf %69, %70 : vector<8x9xf32>
    %72 = vector.extract_strided_slice %71 {offsets = [0, 0], sizes = [4, 8], strides = [1, 1]} : vector<8x9xf32> to vector<4x8xf32>
    %73 = vector.extract_strided_slice %71 {offsets = [4, 1], sizes = [4, 8], strides = [1, 1]} : vector<8x9xf32> to vector<4x8xf32>
    %74 = arith.addf %72, %73 : vector<4x8xf32>
    %75 = vector.broadcast %4 : vector<4x1xf32> to vector<4x8xf32>
    %76 = arith.addf %74, %75 : vector<4x8xf32>
    %c0_69 = arith.constant 0 : index
    %c0_70 = arith.constant 0 : index
    %c4_71 = arith.constant 4 : index
    %c0_72 = arith.constant 0 : index
    %77 = vector.load %arg7[%c0_69, %c0_70, %c4_71, %c0_72] : memref<1x4x8x8xf32, #tpu.memory_space<vmem>>, vector<1x4x1x8xf32>
    %78 = vector.shape_cast %77 : vector<1x4x1x8xf32> to vector<4x8xf32>
    %79 = vector.shape_cast %76 : vector<4x8xf32> to vector<1x4x1x8xf32>
    tpu.vector_store %arg7[%c0_69, %c0_70, %c4_71, %c0_72], %79 {strides = array<i32>} : memref<1x4x8x8xf32, #tpu.memory_space<vmem>>, vector<1x4x1x8xf32>,
    %c0_73 = arith.constant 0 : index
    %c5_74 = arith.constant 5 : index
    %c0_75 = arith.constant 0 : index
    %c0_76 = arith.constant 0 : index
    %80 = vector.load %arg3[%c0_73, %c5_74, %c0_75, %c0_76] : memref<1x8x16x9xf32, #tpu.memory_space<vmem>>, vector<1x1x16x9xf32>
    %81 = vector.shape_cast %80 : vector<1x1x16x9xf32> to vector<16x9xf32>
    %c0_77 = arith.constant 0 : index
    %c6 = arith.constant 6 : index
    %c0_78 = arith.constant 0 : index
    %c0_79 = arith.constant 0 : index
    %82 = vector.load %arg3[%c0_77, %c6, %c0_78, %c0_79] : memref<1x8x16x9xf32, #tpu.memory_space<vmem>>, vector<1x1x16x9xf32>
    %83 = vector.shape_cast %82 : vector<1x1x16x9xf32> to vector<16x9xf32>
    %cst_80 = arith.constant dense<0.000000e+00> : vector<8x9xf32>
    %84 = tpu.matmul %1, %81, %cst_80 {dimension_numbers = #tpu.dot_dimension_numbers<[1], [0], [0], [1], [0, 0, 1, 1], [], []>} : vector<8x16xf32>, vector<16x9xf32>, vector<8x9xf32> -> vector<8x9xf32>
    %cst_81 = arith.constant dense<0.000000e+00> : vector<8x9xf32>
    %85 = tpu.matmul %3, %83, %cst_81 {dimension_numbers = #tpu.dot_dimension_numbers<[1], [0], [0], [1], [0, 0, 1, 1], [], []>} : vector<8x16xf32>, vector<16x9xf32>, vector<8x9xf32> -> vector<8x9xf32>
    %86 = arith.addf %84, %85 : vector<8x9xf32>
    %87 = vector.extract_strided_slice %86 {offsets = [0, 0], sizes = [4, 8], strides = [1, 1]} : vector<8x9xf32> to vector<4x8xf32>
    %88 = vector.extract_strided_slice %86 {offsets = [4, 1], sizes = [4, 8], strides = [1, 1]} : vector<8x9xf32> to vector<4x8xf32>
    %89 = arith.addf %87, %88 : vector<4x8xf32>
    %90 = vector.broadcast %4 : vector<4x1xf32> to vector<4x8xf32>
    %91 = arith.addf %89, %90 : vector<4x8xf32>
    %c0_82 = arith.constant 0 : index
    %c0_83 = arith.constant 0 : index
    %c5_84 = arith.constant 5 : index
    %c0_85 = arith.constant 0 : index
    %92 = vector.load %arg7[%c0_82, %c0_83, %c5_84, %c0_85] : memref<1x4x8x8xf32, #tpu.memory_space<vmem>>, vector<1x4x1x8xf32>
    %93 = vector.shape_cast %92 : vector<1x4x1x8xf32> to vector<4x8xf32>
    %94 = vector.shape_cast %91 : vector<4x8xf32> to vector<1x4x1x8xf32>
    tpu.vector_store %arg7[%c0_82, %c0_83, %c5_84, %c0_85], %94 {strides = array<i32>} : memref<1x4x8x8xf32, #tpu.memory_space<vmem>>, vector<1x4x1x8xf32>,
    %c0_86 = arith.constant 0 : index
    %c6_87 = arith.constant 6 : index
    %c0_88 = arith.constant 0 : index
    %c0_89 = arith.constant 0 : index
    %95 = vector.load %arg3[%c0_86, %c6_87, %c0_88, %c0_89] : memref<1x8x16x9xf32, #tpu.memory_space<vmem>>, vector<1x1x16x9xf32>
    %96 = vector.shape_cast %95 : vector<1x1x16x9xf32> to vector<16x9xf32>
    %c0_90 = arith.constant 0 : index
    %c7 = arith.constant 7 : index
    %c0_91 = arith.constant 0 : index
    %c0_92 = arith.constant 0 : index
    %97 = vector.load %arg3[%c0_90, %c7, %c0_91, %c0_92] : memref<1x8x16x9xf32, #tpu.memory_space<vmem>>, vector<1x1x16x9xf32>
    %98 = vector.shape_cast %97 : vector<1x1x16x9xf32> to vector<16x9xf32>
    %cst_93 = arith.constant dense<0.000000e+00> : vector<8x9xf32>
    %99 = tpu.matmul %1, %96, %cst_93 {dimension_numbers = #tpu.dot_dimension_numbers<[1], [0], [0], [1], [0, 0, 1, 1], [], []>} : vector<8x16xf32>, vector<16x9xf32>, vector<8x9xf32> -> vector<8x9xf32>
    %cst_94 = arith.constant dense<0.000000e+00> : vector<8x9xf32>
    %100 = tpu.matmul %3, %98, %cst_94 {dimension_numbers = #tpu.dot_dimension_numbers<[1], [0], [0], [1], [0, 0, 1, 1], [], []>} : vector<8x16xf32>, vector<16x9xf32>, vector<8x9xf32> -> vector<8x9xf32>
    %101 = arith.addf %99, %100 : vector<8x9xf32>
    %102 = vector.extract_strided_slice %101 {offsets = [0, 0], sizes = [4, 8], strides = [1, 1]} : vector<8x9xf32> to vector<4x8xf32>
    %103 = vector.extract_strided_slice %101 {offsets = [4, 1], sizes = [4, 8], strides = [1, 1]} : vector<8x9xf32> to vector<4x8xf32>
    %104 = arith.addf %102, %103 : vector<4x8xf32>
    %105 = vector.broadcast %4 : vector<4x1xf32> to vector<4x8xf32>
    %106 = arith.addf %104, %105 : vector<4x8xf32>
    %c0_95 = arith.constant 0 : index
    %c0_96 = arith.constant 0 : index
    %c6_97 = arith.constant 6 : index
    %c0_98 = arith.constant 0 : index
    %107 = vector.load %arg7[%c0_95, %c0_96, %c6_97, %c0_98] : memref<1x4x8x8xf32, #tpu.memory_space<vmem>>, vector<1x4x1x8xf32>
    %108 = vector.shape_cast %107 : vector<1x4x1x8xf32> to vector<4x8xf32>
    %109 = vector.shape_cast %106 : vector<4x8xf32> to vector<1x4x1x8xf32>
    tpu.vector_store %arg7[%c0_95, %c0_96, %c6_97, %c0_98], %109 {strides = array<i32>} : memref<1x4x8x8xf32, #tpu.memory_space<vmem>>, vector<1x4x1x8xf32>,
    %c0_99 = arith.constant 0 : index
    %c7_100 = arith.constant 7 : index
    %c0_101 = arith.constant 0 : index
    %c0_102 = arith.constant 0 : index
    %110 = vector.load %arg3[%c0_99, %c7_100, %c0_101, %c0_102] : memref<1x8x16x9xf32, #tpu.memory_space<vmem>>, vector<1x1x16x9xf32>
    %111 = vector.shape_cast %110 : vector<1x1x16x9xf32> to vector<16x9xf32>
    %c0_103 = arith.constant 0 : index
    %c0_104 = arith.constant 0 : index
    %c0_105 = arith.constant 0 : index
    %c0_106 = arith.constant 0 : index
    %112 = vector.load %arg4[%c0_103, %c0_104, %c0_105, %c0_106] : memref<1x1x16x9xf32, #tpu.memory_space<vmem>>, vector<1x1x16x9xf32>
    %113 = vector.shape_cast %112 : vector<1x1x16x9xf32> to vector<16x9xf32>
    %cst_107 = arith.constant dense<0.000000e+00> : vector<8x9xf32>
    %114 = tpu.matmul %1, %111, %cst_107 {dimension_numbers = #tpu.dot_dimension_numbers<[1], [0], [0], [1], [0, 0, 1, 1], [], []>} : vector<8x16xf32>, vector<16x9xf32>, vector<8x9xf32> -> vector<8x9xf32>
    %cst_108 = arith.constant dense<0.000000e+00> : vector<8x9xf32>
    %115 = tpu.matmul %3, %113, %cst_108 {dimension_numbers = #tpu.dot_dimension_numbers<[1], [0], [0], [1], [0, 0, 1, 1], [], []>} : vector<8x16xf32>, vector<16x9xf32>, vector<8x9xf32> -> vector<8x9xf32>
    %116 = arith.addf %114, %115 : vector<8x9xf32>
    %117 = vector.extract_strided_slice %116 {offsets = [0, 0], sizes = [4, 8], strides = [1, 1]} : vector<8x9xf32> to vector<4x8xf32>
    %118 = vector.extract_strided_slice %116 {offsets = [4, 1], sizes = [4, 8], strides = [1, 1]} : vector<8x9xf32> to vector<4x8xf32>
    %119 = arith.addf %117, %118 : vector<4x8xf32>
    %120 = vector.broadcast %4 : vector<4x1xf32> to vector<4x8xf32>
    %121 = arith.addf %119, %120 : vector<4x8xf32>
    %c0_109 = arith.constant 0 : index
    %c0_110 = arith.constant 0 : index
    %c7_111 = arith.constant 7 : index
    %c0_112 = arith.constant 0 : index
    %122 = vector.load %arg7[%c0_109, %c0_110, %c7_111, %c0_112] : memref<1x4x8x8xf32, #tpu.memory_space<vmem>>, vector<1x4x1x8xf32>
    %123 = vector.shape_cast %122 : vector<1x4x1x8xf32> to vector<4x8xf32>
    %124 = vector.shape_cast %121 : vector<4x8xf32> to vector<1x4x1x8xf32>
    tpu.vector_store %arg7[%c0_109, %c0_110, %c7_111, %c0_112], %124 {strides = array<i32>} : memref<1x4x8x8xf32, #tpu.memory_space<vmem>>, vector<1x4x1x8xf32>,
    return
  }
  func.func @transform_0(%arg0: i32, %arg1: i32, %arg2: i32) -> (i32, i32, i32, i32) {
    %c0_i32 = arith.constant 0 : i32
    %c0_i32_0 = arith.constant 0 : i32
    %c0_i32_1 = arith.constant 0 : i32
    return %arg0, %arg2, %c0_i32, %c0_i32_0 : i32, i32, i32, i32
  }
  func.func @transform_1(%arg0: i32, %arg1: i32, %arg2: i32) -> (i32, i32, i32, i32) {
    %c8_i32 = arith.constant 8 : i32
    %0 = arith.muli %arg2, %c8_i32 : i32
    %c8_i32_0 = arith.constant 8 : i32
    %1 = arith.addi %0, %c8_i32_0 : i32
    %c0_i32 = arith.constant 0 : i32
    %c0_i32_1 = arith.constant 0 : i32
    %c0_i32_2 = arith.constant 0 : i32
    return %arg0, %1, %c0_i32, %c0_i32_1 : i32, i32, i32, i32
  }
  func.func @transform_2(%arg0: i32, %arg1: i32, %arg2: i32) -> (i32, i32, i32, i32) {
    %c0_i32 = arith.constant 0 : i32
    %c0_i32_0 = arith.constant 0 : i32
    %c0_i32_1 = arith.constant 0 : i32
    %c0_i32_2 = arith.constant 0 : i32
    return %arg1, %c0_i32, %c0_i32_0, %c0_i32_1 : i32, i32, i32, i32
  }
  func.func @transform_3(%arg0: i32, %arg1: i32, %arg2: i32) -> (i32, i32) {
    %c0_i32 = arith.constant 0 : i32
    %c0_i32_0 = arith.constant 0 : i32
    return %arg1, %c0_i32 : i32, i32
  }
  func.func @transform_4(%arg0: i32, %arg1: i32, %arg2: i32) -> (i32, i32, i32, i32) {
    %c0_i32 = arith.constant 0 : i32
    %c0_i32_0 = arith.constant 0 : i32
    return %arg0, %arg1, %arg2, %c0_i32 : i32, i32, i32, i32
  }
}

</mosaic_0001>

<bundles_post_ra>
// kernel: tpu_custom_call.1
= control target key start
LH: loop header
LB: loop body
LE: loop exit
PB: predicated region body
PF: predicated region fallthrough
CT: control target
= control target key end

     0   :  { %9 = vsyncpa [#allocation3], 0  ;;  %s2826_s0 = inlined_call_operand.vmem [shape: f32[2,9,16,9], index: 0, kind: input, shape index: {}]   ;;  %s2827_s1 = inlined_call_operand.vmem [shape: f32[2,9,16,9], index: 1, kind: input, shape index: {}]   ;;  %s2828_s2 = inlined_call_operand.vmem [shape: f32[1,2,8,16], index: 2, kind: input, shape index: {}]   ;;  %s2829_s3 = inlined_call_operand.vmem [shape: f32[4,1], index: 3, kind: input, shape index: {}]   ;;  %s2830_s4 = inlined_call_operand.hbm [shape: f32[2,4,8,8], index: 4, kind: output, shape index: {}]  }
   0x1   :  { %11 = vsyncpa [#allocation3 + $0x1], 0  ;;  %s2467_s15 = smov 0   ;;  %s2469_s16 = smov 0  }
   0x2   :  { %s2471_s17 = smov 0   ;;  %s2473_s18 = smov 0  }
   0x3   :  { %s2475_s19 = smov 0   ;;  %s2477_s20 = smov 0  }
   0x4 LB: > { %s1999_s21 = sadd.s32 4294967295, %s2431_s20   ;;  %s2000_s22 = sadd.s32 4294967294, %s2431_s20   ;;  %s2431_s20 = sphi %s2477_s20, %s17_s20   ;;  %s2427_s19 = sphi %s2475_s19, %s2837_s19   ;;  %s2423_s18 = sphi %s2473_s18, %s2836_s18   ;;  %s2419_s17 = sphi %s2471_s17, %s2835_s17   ;;  %s2415_s16 = sphi %s2469_s16, %s2834_s16   ;;  %s2411_s15 = sphi %s2467_s15, %s2833_s15  }
   0x5   : > { %s36_s23 = sadd.s32 1, %s2427_s19  ;;  %s159_s24 = sadd.s32 1, %s2419_s17 }
   0x6   : > { %p38_p0 = scmp.ge.s32.totalorder %s36_s23, 2  ;;  %p169_p1 = scmp.ne.s32.totalorder %s2419_s17, %s2415_s16 }
   0x7   : > { %p170_p2 = scmp.eq.s32.totalorder %s1999_s21, 1  ;;  %p175_p3 = scmp.ne.s32.totalorder %s2415_s16, %s2411_s15 }
   0x8   : > { %s2839_s23 = smov (%p38_p0, %s36_s23), 0  ;;  %p176_p5 = scmp.eq.s32.totalorder %s2000_s22, 1 }
   0x9   : > { %p2507_p4 = por %p170_p2, %p169_p1  ;;  %s152_s26 = ssub.s32 %s2427_s19, %s2839_s23 }
   0xa   : > { %p2005_p6 = scmp.ge.s32.totalorder %s2431_s20, 1  ;;  %p157_p7 = scmp.eq.s32.totalorder %s152_s26, 0 }
   0xb   : > { %p2514_p8 = por %p176_p5, %p175_p3  ;;  %p249_p9 = scmp.lt.s32.totalorder %s2431_s20, 3 }
   0xc   : > { %s2520_s28 = scalar_select %p157_p7, %s2419_s17, %s159_s24  }
   0xd   : > { %p250_p10 = pnand %p2005_p6, %p249_p9 }
   0xe   : > { %p311_p11 = scmp.lt.s32.totalorder (!%p250_p10), %s2423_s18, 1  ;;  %v2433_v0 = vmov (!%p250_p10), 0.0|0.0   ;;  %v352_v1 = vld [vmem:[%s2829_s3] sm:$0xf] (!%p250_p10)  ;;  %vm2434_vm0 = vmmov (!%p250_p10), 0   ;;  %v2435_v2 = vmov (!%p250_p10), 0.0   ;;  %v521_v59 = vlaneseq (!%p250_p10) }
   0xf   : > { %253 = sbr.rel (%p250_p10) target bundleno = 434 (0x1b2), region = 36  ;;  %2222 = vmatprep.subr.bf16.mxu0 (!%p250_p10), %v2433_v0  ;;  %2228 = vmatprep.subr.bf16.mxu1 (!%p250_p10), %v2433_v0  ;;  %v2436_v3 = vmov (!%p250_p10), 0   ;;  %v2552_v12 = vld [vmem:[%s2828_s2 + $0x8] sm:$0xff] (!%p250_p10)  ;;  %vm358_vm1 = vcmask (!%p250_p10), 130048   ;;  %v2573_v18 = vld [vmem:[%s2828_s2] sm:$0xff] (!%p250_p10)  ;;  %s2437_s26 = smov (!%p250_p10), 127  }
  0x10   : > { %2114 = vmatprep.mubr.msk.f32.mxu0 (!%p250_p10), %vm2434_vm0, %v2435_v2  ;;  %2128 = vmatprep.mubr.msk.f32.mxu1 (!%p250_p10), %vm2434_vm0, %v2435_v2  ;;  %v2438_v57 = vmov (!%p250_p10), 1966171168   ;;  %v522_v62 = vshrl.u32 (!%p250_p10), %v521_v59, 7  ;;  %s302_s29 = sand.u32 (!%p250_p10), 1, %s2415_s16   ;;  %vm546_vm2 = vcmask (!%p250_p10), 57344   ;;  %s2439_s12 = smov (!%p250_p10), [#allocation2]  }
  0x11   : > { %2352 = vset.pattern.permute.xlu0 (!%p250_p10), %v2436_v3  ;;  %v519_v58 = vunpack.c.l.s4 (!%p250_p10), %v2438_v57  ;;  %s2006_s30 = sshll.u32 (!%p250_p10), %s302_s29, 5  ;;  %s2780_s10 = scalar_lea.sflag (!%p250_p10), [#allocation3], %s302_s29 }
  0x12   : > { %513 = vperm.xlu0 (!%p250_p10), %2352, %v352_v1   ;;  %s2357_s13 = sshll.u32 (!%p250_p10), %s2439_s12, 4  ;;  %s2358_s13 = int_to_ptr.vmem [resolvable:$false] %s2357_s13 }
  0x13   : > { %v520_v61 = vunpack.c.0.s8 (!%p250_p10), %v519_v58 }
  0x16   : > { %s2529_s5 = scalar_select %p311_p11, %s2423_s18, 1 }
  0x18   : > { %s2286_s6 = smul.u32 144, %s2529_s5  ;;  %s2674_s5 = scalar_lea.vmem [#allocation2], %s2006_s30 }
  0x19   : > { %s1862_s7 = sshll.u32 %s2674_s5, 4  ;;  %s2768_s7 = int_to_ptr.vmem [resolvable:$true] %s1862_s7 }
  0x1a   : > { %s2541_s9 = scalar_lea.vmem %s2826_s0, %s2286_s6  ;;  %s2060_s14 = sadd.s32 128, %s2286_s6 }
  0x1b   : > { %v2010_v4 = vld [vmem:[%s2541_s9 + $0x10] sm:$0xff]  ;;  %v2011_v5 = vld [vmem:[%s2541_s9 + $0x18] sm:$0xff]  ;;  %v2016_v6 = vld [vmem:[%s2541_s9 + $0x20] sm:$0xff]  ;;  %s336_s24 = scalar_lea.vmem %s2827_s1, %s2060_s14  ;;  %s2061_s6 = sshll.u32 %s2423_s18, 9 }
  0x1c   : > { %v2223_v7 = vpack.c.bf16 %v2011_v5, %v2010_v4  ;;  %v2017_v8 = vld [vmem:[%s2541_s9 + $0x28] sm:$0xff]  ;;  %v353_v9 = vld [vmem:[%s2541_s9] sm:$0xff]  ;;  %v2022_v14 = vld [vmem:[%s2541_s9 + $0x30] sm:$0xff]  ;;  %s2353_s11 = scalar_lea.vmem %s2768_s7, 512  ;;  %s2359_s14 = scalar_lea.vmem %s2358_s13, 1024 }
  0x1d   : > { %v354_v10 = vld [vmem:[%s2541_s9 + $0x8] sm:$0xff]  ;;  %v2229_v11 = vpack.c.bf16 %v2017_v8, %v2016_v6  ;;  %v2023_v15 = vld [vmem:[%s2541_s9 + $0x38] sm:$0xff]  ;;  %v2028_v16 = vld [vmem:[%s2541_s9 + $0x40] sm:$0xff]  ;;  %p2354_p12 = scmp.ne.s32.totalorder %s2768_s7, %s2353_s11  ;;  %p2360_p1 = scmp.lt.s32.totalorder %s2768_s7, %s2358_s13 }
  0x1e   : > { %2224 = vmatpush3.bf16.msra.mxu0 %v2223_v7  ;;  %v2226_v13 = vpack.c.bf16 %v354_v10, %v353_v9  ;;  %v2029_v17 = vld [vmem:[%s2541_s9 + $0x48] sm:$0xff]  ;;  %v2235_v19 = vpack.c.bf16 %v2023_v15, %v2022_v14  ;;  %v2034_v21 = vld [vmem:[%s2541_s9 + $0x50] sm:$0xff]  ;;  %v2035_v22 = vld [vmem:[%s2541_s9 + $0x58] sm:$0xff]  ;;  %p2361_p2 = scmp.lt.s32.totalorder %s2359_s14, %s2353_s11 }
  0x1f   : > { %2230 = vmatpush3.bf16.msra.mxu1 %v2229_v11  ;;  %2225 = vmatprep.subr.bf16.mxu0 %v2433_v0  ;;  %v2241_v20 = vpack.c.bf16 %v2029_v17, %v2028_v16  ;;  %v2040_v23 = vld [vmem:[%s2541_s9 + $0x60] sm:$0xff]  ;;  %v2041_v24 = vld [vmem:[%s2541_s9 + $0x68] sm:$0xff]  ;;  %v2247_v25 = vpack.c.bf16 %v2035_v22, %v2034_v21  ;;  %v2046_v27 = vld [vmem:[%s2541_s9 + $0x70] sm:$0xff]  ;;  %p2355_p13 = pnand %p2354_p12, %p2507_p4 }
  0x20   : > { %2231 = vmatprep.subr.bf16.mxu1 %v2433_v0  ;;  %v2253_v26 = vpack.c.bf16 %v2041_v24, %v2040_v23  ;;  %v2047_v28 = vld [vmem:[%s2541_s9 + $0x78] sm:$0xff]  ;;  %v1663_v29 = vld [vmem:[%s336_s24] sm:$0xff]  ;;  %v1664_v30 = vld [vmem:[%s336_s24 + $0x8] sm:$0xff]  ;;  %s2766_s9 = scalar_lea.hbm %s2830_s4, %s2061_s6  ;;  %p2362_p3 = por %p2361_p2, %p2360_p1 }
  0x21   : > { %2115 = vmatmul.mubr.msk.f32.vlgmr.msra.gmra.mrb[0].mxu0 %vm358_vm1, %v2552_v12  ;;  %v2259_v31 = vpack.c.bf16 %v2047_v28, %v2046_v27  ;;  %v2265_v32 = vpack.c.bf16 %v1664_v30, %v1663_v29  ;;  %p2356_p0 = pneg %p2355_p13 }
  0x22   : > { %2129 = vmatmul.mubr.msk.f32.vlgmr.msra.gmra.mrb[0].mxu1 %vm358_vm1, %v2552_v12  ;;  %2227 = vmatpush3.bf16.msra.mxu0 %v2226_v13 }
  0x23   : > { %2233 = vmatpush3.bf16.msra.mxu1 %v2223_v7  ;;  %2121 = vmatprep.mubr.msk.f32.mxu0 %vm2434_vm0, %v2435_v2  ;;  %p2363_p5 = pnand %p2362_p3, %p2356_p0 }
  0x24   : > { %2135 = vmatprep.mubr.msk.f32.mxu1 %vm2434_vm0, %v2435_v2  ;;  %2234 = vmatprep.subr.bf16.mxu0 %v2433_v0 }
  0x25   : > { %2240 = vmatprep.subr.bf16.mxu1 %v2433_v0 }
  0x29   : > { %2122 = vmatmul.mubr.msk.f32.vlgmr.msra.gmra.mrb[0].mxu0 %vm358_vm1, %v2573_v18 }
  0x2a   : > { %2136 = vmatmul.mubr.msk.f32.vlgmr.msra.gmra.mrb[0].mxu1 %vm358_vm1, %v2573_v18  ;;  %2236 = vmatpush3.bf16.msra.mxu0 %v2235_v19 }
  0x2b   : > { %2242 = vmatpush3.bf16.msra.mxu1 %v2241_v20  ;;  %2142 = vmatprep.mubr.msk.f32.mxu0 %vm2434_vm0, %v2435_v2 }
  0x2c   : > { %2156 = vmatprep.mubr.msk.f32.mxu1 %vm2434_vm0, %v2435_v2  ;;  %2237 = vmatprep.subr.bf16.mxu0 %v2433_v0 }
  0x2d   : > { %2143 = vmatmul.mubr.msk.f32.vlgmr.msra.gmra.mrb[2].mxu0 %vm358_vm1, %v2552_v12  ;;  %2243 = vmatprep.subr.bf16.mxu1 %v2433_v0 }
  0x2e   : > { %2157 = vmatmul.mubr.msk.f32.vlgmr.msra.gmra.mrb[2].mxu1 %vm358_vm1, %v2552_v12  ;;  %2239 = vmatpush3.bf16.msra.mxu0 %v2229_v11 }
  0x2f   : > { %2245 = vmatpush3.bf16.msra.mxu1 %v2235_v19  ;;  %2149 = vmatprep.mubr.msk.f32.mxu0 %vm2434_vm0, %v2435_v2 }
  0x30   : > { %2163 = vmatprep.mubr.msk.f32.mxu1 %vm2434_vm0, %v2435_v2  ;;  %2246 = vmatprep.subr.bf16.mxu0 %v2433_v0 }
  0x31   : > { %2252 = vmatprep.subr.bf16.mxu1 %v2433_v0 }
  0x35   : > { %2150 = vmatmul.mubr.msk.f32.vlgmr.msra.gmra.mrb[2].mxu0 %vm358_vm1, %v2573_v18 }
  0x36   : > { %2164 = vmatmul.mubr.msk.f32.vlgmr.msra.gmra.mrb[2].mxu1 %vm358_vm1, %v2573_v18  ;;  %2248 = vmatpush3.bf16.msra.mxu0 %v2247_v25 }
  0x37   : > { %2254 = vmatpush3.bf16.msra.mxu1 %v2253_v26  ;;  %2170 = vmatprep.mubr.msk.f32.mxu0 %vm2434_vm0, %v2435_v2 }
  0x38   : > { %2184 = vmatprep.mubr.msk.f32.mxu1 %vm2434_vm0, %v2435_v2  ;;  %2249 = vmatprep.subr.bf16.mxu0 %v2433_v0 }
  0x39   : > { %2171 = vmatmul.mubr.msk.f32.vlgmr.msra.gmra.mrb[4].mxu0 %vm358_vm1, %v2552_v12  ;;  %2255 = vmatprep.subr.bf16.mxu1 %v2433_v0 }
  0x3a   : > { %2185 = vmatmul.mubr.msk.f32.vlgmr.msra.gmra.mrb[4].mxu1 %vm358_vm1, %v2552_v12  ;;  %2251 = vmatpush3.bf16.msra.mxu0 %v2241_v20 }
  0x3b   : > { %2257 = vmatpush3.bf16.msra.mxu1 %v2247_v25  ;;  %2177 = vmatprep.mubr.msk.f32.mxu0 %vm2434_vm0, %v2435_v2 }
  0x3c   : > { %2191 = vmatprep.mubr.msk.f32.mxu1 %vm2434_vm0, %v2435_v2  ;;  %2258 = vmatprep.subr.bf16.mxu0 %v2433_v0 }
  0x3d   : > { %2264 = vmatprep.subr.bf16.mxu1 %v2433_v0 }
  0x41   : > { %2178 = vmatmul.mubr.msk.f32.vlgmr.msra.gmra.mrb[4].mxu0 %vm358_vm1, %v2573_v18 }
  0x42   : > { %2192 = vmatmul.mubr.msk.f32.vlgmr.msra.gmra.mrb[4].mxu1 %vm358_vm1, %v2573_v18  ;;  %2260 = vmatpush3.bf16.msra.mxu0 %v2259_v31 }
  0x43   : > { %2266 = vmatpush3.bf16.msra.mxu1 %v2265_v32  ;;  %2198 = vmatprep.mubr.msk.f32.mxu0 %vm2434_vm0, %v2435_v2 }
  0x44   : > { %2212 = vmatprep.mubr.msk.f32.mxu1 %vm2434_vm0, %v2435_v2  ;;  %2261 = vmatprep.subr.bf16.mxu0 %v2433_v0 }
  0x45   : > { %2199 = vmatmul.mubr.msk.f32.vlgmr.msra.gmra.mrb[6].mxu0 %vm358_vm1, %v2552_v12  ;;  %2267 = vmatprep.subr.bf16.mxu1 %v2433_v0  ;;  %v2663_v0 = vsub.s32 %v520_v61, %v522_v62 }
  0x46   : > { %2213 = vmatmul.mubr.msk.f32.vlgmr.msra.gmra.mrb[6].mxu1 %vm358_vm1, %v2552_v12  ;;  %2263 = vmatpush3.bf16.msra.mxu0 %v2253_v26 }
  0x47   : > { %2269 = vmatpush3.bf16.msra.mxu1 %v2259_v31  ;;  %2205 = vmatprep.mubr.msk.f32.mxu0 %vm2434_vm0, %v2435_v2 }
  0x48   : > { %2219 = vmatprep.mubr.msk.f32.mxu1 %vm2434_vm0, %v2435_v2 }
  0x4d   : > { %2206 = vmatmul.mubr.msk.f32.vlgmr.msra.gmra.mrb[6].mxu0 %vm358_vm1, %v2573_v18 }
  0x4e   : > { %2220 = vmatmul.mubr.msk.f32.vlgmr.msra.gmra.mrb[6].mxu1 %vm358_vm1, %v2573_v18 }
  0x91   : > { %v2660_v60 = vpop.permute.xlu0 %513 }
  0xfc   : > { %v501_v33 = vpop.f32.mrb[0].mxu0 }
  0xfd   : > { %v506_v34 = vrot.slane %v501_v33, 4  ;;  %v692_v35 = vpop.f32.mrb[0].mxu1  ;;  %v2123_v36 = vpop.f32.mrb[1].mxu0 }
  0xfe   : > { %v2137_v37 = vpop.f32.mrb[1].mxu1  ;;  %v697_v38 = vrot.slane %v692_v35, 4 }
  0xff   : > { %507 = vrot.lane.b32.xlu0 %v506_v34, %s2437_s26 }
 0x100   : > { %698 = vrot.lane.b32.xlu1 %v697_v38, %s2437_s26 }
 0x108   : > { %v877_v39 = vpop.f32.mrb[2].mxu0 }
 0x109   : > { %v882_v40 = vrot.slane %v877_v39, 4  ;;  %v1062_v41 = vpop.f32.mrb[2].mxu1  ;;  %v2151_v42 = vpop.f32.mrb[3].mxu0 }
 0x10a   : > { %v1067_v43 = vrot.slane %v1062_v41, 4  ;;  %v2165_v44 = vpop.f32.mrb[3].mxu1 }
 0x10b   : > { %883 = vrot.lane.b32.xlu1 %v882_v40, %s2437_s26 }
 0x10c   : > { %1068 = vrot.lane.b32.xlu0 %v1067_v43, %s2437_s26 }
 0x114   : > { %v2648_v45 = vpop.f32.mrb[4].mxu0 }
 0x115   : > { %v1252_v46 = vrot.slane %v2648_v45, 4  ;;  %v2651_v47 = vpop.f32.mrb[4].mxu1  ;;  %v2179_v48 = vpop.f32.mrb[5].mxu0 }
 0x116   : > { %v1437_v49 = vrot.slane %v2651_v47, 4  ;;  %v2193_v50 = vpop.f32.mrb[5].mxu1 }
 0x117   : > { %1253 = vrot.lane.b32.xlu1 %v1252_v46, %s2437_s26 }
 0x118   : > { %1438 = vrot.lane.b32.xlu0 %v1437_v49, %s2437_s26 }
 0x120   : > { %v2654_v51 = vpop.f32.mrb[6].mxu0 }
 0x121   : > { %v1622_v52 = vrot.slane %v2654_v51, 4  ;;  %v2657_v53 = vpop.f32.mrb[6].mxu1  ;;  %v2207_v54 = vpop.f32.mrb[7].mxu0 }
 0x122   : > { %v1806_v55 = vrot.slane %v2657_v53, 4  ;;  %v2221_v56 = vpop.f32.mrb[7].mxu1 }
 0x123   : > { %1623 = vrot.lane.b32.xlu1 %v1622_v52, %s2437_s26 }
 0x124   : > { %1807 = vrot.lane.b32.xlu0 %v1806_v55, %s2437_s26 }
 0x171   : > { %v508_v63 = vpop.permute.xlu0 %507 }
 0x172   : > { %v699_v1 = vpop.permute.xlu1 %698  ;;  %v510_v2 = vadd.f32 %v508_v63, %v501_v33 }
 0x173   : > { %v701_v3 = vadd.f32 %v699_v1, %v692_v35 }
 0x174   : > { %v516_v4 = vadd.f32 %v2660_v60, %v510_v2 }
 0x175   : > { %v702_v5 = vadd.f32 %v701_v3, %v2660_v60 }
 0x176   : > { %v524_v6 = vrot.slane %v516_v4, %v2663_v0 }
 0x177   : > { %v710_v7 = vrot.slane %v702_v5, %v2663_v0 }
 0x178   : > { %v525_v8 = vcombine.high %v524_v6, %v524_v6  ;;  %v532_v9 = vrot.slane %v524_v6, %v2663_v0 }
 0x179   : > { %v711_v10 = vcombine.high %v710_v7, %v710_v7  ;;  %v718_v11 = vrot.slane %v710_v7, %v2663_v0 }
 0x17a   : > { %v539_v12 = vrot.slane %v525_v8, %v2663_v0  ;;  %v540_v13 = vcombine.high %v532_v9, %v532_v9  ;;  %547 = vst.msk [vmem:[%s2674_s5] sm:$0x1] %vm546_vm2, %v532_v9 }
 0x17b   : > { %v725_v14 = vrot.slane %v711_v10, %v2663_v0  ;;  %v726_v15 = vcombine.high %v718_v11, %v718_v11  ;;  %732 = vst.msk [vmem:[%s2674_s5 + $0x1] sm:$0x1] %vm546_vm2, %v718_v11 }
 0x17c   : > { %v541_v16 = vcombine.high %v539_v12, %v539_v12  ;;  %548 = vst.msk [vmem:[%s2674_s5 + $0x8] sm:$0x1] %vm546_vm2, %v539_v12  ;;  %549 = vst.msk [vmem:[%s2674_s5 + $0x10] sm:$0x1] %vm546_vm2, %v540_v13 }
 0x17d   : > { %v727_v17 = vcombine.high %v725_v14, %v725_v14  ;;  %733 = vst.msk [vmem:[%s2674_s5 + $0x9] sm:$0x1] %vm546_vm2, %v725_v14  ;;  %734 = vst.msk [vmem:[%s2674_s5 + $0x11] sm:$0x1] %vm546_vm2, %v726_v15  ;;  %v884_v18 = vpop.permute.xlu1 %883 }
 0x17e   : > { %550 = vst.msk [vmem:[%s2674_s5 + $0x18] sm:$0x1] %vm546_vm2, %v541_v16  ;;  %v1069_v19 = vpop.permute.xlu0 %1068  ;;  %v886_v20 = vadd.f32 %v884_v18, %v877_v39 }
 0x17f   : > { %735 = vst.msk [vmem:[%s2674_s5 + $0x19] sm:$0x1] %vm546_vm2, %v727_v17  ;;  %v1071_v21 = vadd.f32 %v1069_v19, %v1062_v41 }
 0x180   : > { %v887_v22 = vadd.f32 %v886_v20, %v2660_v60 }
 0x181   : > { %v1072_v23 = vadd.f32 %v1071_v21, %v2660_v60 }
 0x182   : > { %v895_v24 = vrot.slane %v887_v22, %v2663_v0 }
 0x183   : > { %v1080_v25 = vrot.slane %v1072_v23, %v2663_v0 }
 0x184   : > { %v896_v26 = vcombine.high %v895_v24, %v895_v24  ;;  %v903_v27 = vrot.slane %v895_v24, %v2663_v0 }
 0x185   : > { %v1081_v28 = vcombine.high %v1080_v25, %v1080_v25  ;;  %v1088_v29 = vrot.slane %v1080_v25, %v2663_v0 }
 0x186   : > { %v910_v30 = vrot.slane %v896_v26, %v2663_v0  ;;  %v911_v31 = vcombine.high %v903_v27, %v903_v27  ;;  %917 = vst.msk [vmem:[%s2674_s5 + $0x2] sm:$0x1] %vm546_vm2, %v903_v27 }
 0x187   : > { %v1095_v32 = vrot.slane %v1081_v28, %v2663_v0  ;;  %v1096_v33 = vcombine.high %v1088_v29, %v1088_v29  ;;  %1102 = vst.msk [vmem:[%s2674_s5 + $0x3] sm:$0x1] %vm546_vm2, %v1088_v29 }
 0x188   : > { %v912_v34 = vcombine.high %v910_v30, %v910_v30  ;;  %918 = vst.msk [vmem:[%s2674_s5 + $0xa] sm:$0x1] %vm546_vm2, %v910_v30  ;;  %919 = vst.msk [vmem:[%s2674_s5 + $0x12] sm:$0x1] %vm546_vm2, %v911_v31 }
 0x189   : > { %v1097_v35 = vcombine.high %v1095_v32, %v1095_v32  ;;  %1103 = vst.msk [vmem:[%s2674_s5 + $0xb] sm:$0x1] %vm546_vm2, %v1095_v32  ;;  %1104 = vst.msk [vmem:[%s2674_s5 + $0x13] sm:$0x1] %vm546_vm2, %v1096_v33  ;;  %v1254_v36 = vpop.permute.xlu1 %1253 }
 0x18a   : > { %920 = vst.msk [vmem:[%s2674_s5 + $0x1a] sm:$0x1] %vm546_vm2, %v912_v34  ;;  %v1439_v37 = vpop.permute.xlu0 %1438  ;;  %v1256_v38 = vadd.f32 %v1254_v36, %v2648_v45 }
 0x18b   : > { %1105 = vst.msk [vmem:[%s2674_s5 + $0x1b] sm:$0x1] %vm546_vm2, %v1097_v35  ;;  %v1441_v39 = vadd.f32 %v1439_v37, %v2651_v47 }
 0x18c   : > { %v1257_v40 = vadd.f32 %v1256_v38, %v2660_v60 }
 0x18d   : > { %v1442_v41 = vadd.f32 %v1441_v39, %v2660_v60 }
 0x18e   : > { %v1265_v42 = vrot.slane %v1257_v40, %v2663_v0 }
 0x18f   : > { %v1450_v43 = vrot.slane %v1442_v41, %v2663_v0 }
 0x190   : > { %v1266_v44 = vcombine.high %v1265_v42, %v1265_v42  ;;  %v1273_v45 = vrot.slane %v1265_v42, %v2663_v0 }
 0x191   : > { %v1451_v46 = vcombine.high %v1450_v43, %v1450_v43  ;;  %v1458_v48 = vrot.slane %v1450_v43, %v2663_v0 }
 0x192   : > { %v1280_v47 = vrot.slane %v1266_v44, %v2663_v0  ;;  %v1281_v49 = vcombine.high %v1273_v45, %v1273_v45  ;;  %1287 = vst.msk [vmem:[%s2674_s5 + $0x4] sm:$0x1] %vm546_vm2, %v1273_v45 }
 0x193   : > { %v1465_v50 = vrot.slane %v1451_v46, %v2663_v0  ;;  %v1466_v52 = vcombine.high %v1458_v48, %v1458_v48  ;;  %1472 = vst.msk [vmem:[%s2674_s5 + $0x5] sm:$0x1] %vm546_vm2, %v1458_v48 }
 0x194   : > { %v1282_v54 = vcombine.high %v1280_v47, %v1280_v47  ;;  %1288 = vst.msk [vmem:[%s2674_s5 + $0xc] sm:$0x1] %vm546_vm2, %v1280_v47  ;;  %1289 = vst.msk [vmem:[%s2674_s5 + $0x14] sm:$0x1] %vm546_vm2, %v1281_v49 }
 0x195   : > { %v1467_v55 = vcombine.high %v1465_v50, %v1465_v50  ;;  %1473 = vst.msk [vmem:[%s2674_s5 + $0xd] sm:$0x1] %vm546_vm2, %v1465_v50  ;;  %1474 = vst.msk [vmem:[%s2674_s5 + $0x15] sm:$0x1] %vm546_vm2, %v1466_v52  ;;  %v1624_v56 = vpop.permute.xlu1 %1623 }
 0x196   : > { %1290 = vst.msk [vmem:[%s2674_s5 + $0x1c] sm:$0x1] %vm546_vm2, %v1282_v54  ;;  %v1808_v57 = vpop.permute.xlu0 %1807  ;;  %v1626_v58 = vadd.f32 %v1624_v56, %v2654_v51 }
 0x197   : > { %1475 = vst.msk [vmem:[%s2674_s5 + $0x1d] sm:$0x1] %vm546_vm2, %v1467_v55  ;;  %v1810_v59 = vadd.f32 %v1808_v57, %v2657_v53 }
 0x198   : > { %v1627_v61 = vadd.f32 %v1626_v58, %v2660_v60 }
 0x199   : > { %v1811_v62 = vadd.f32 %v1810_v59, %v2660_v60 }
 0x19a   : > { %v1635_v63 = vrot.slane %v1627_v61, %v2663_v0 }
 0x19b   : > { %v1819_v1 = vrot.slane %v1811_v62, %v2663_v0 }
 0x19c   : > { %v1636_v2 = vcombine.high %v1635_v63, %v1635_v63  ;;  %v1643_v3 = vrot.slane %v1635_v63, %v2663_v0 }
 0x19d   : > { %v1820_v4 = vcombine.high %v1819_v1, %v1819_v1  ;;  %v1827_v51 = vrot.slane %v1819_v1, %v2663_v0 }
 0x19e   : > { %v1650_v53 = vrot.slane %v1636_v2, %v2663_v0  ;;  %v1651_v60 = vcombine.high %v1643_v3, %v1643_v3  ;;  %1657 = vst.msk [vmem:[%s2674_s5 + $0x6] sm:$0x1] %vm546_vm2, %v1643_v3 }
 0x19f   : > { %v1834_v5 = vrot.slane %v1820_v4, %v2663_v0  ;;  %v1835_v6 = vcombine.high %v1827_v51, %v1827_v51  ;;  %1841 = vst.msk [vmem:[%s2674_s5 + $0x7] sm:$0x1] %vm546_vm2, %v1827_v51 }
 0x1a0   : > { %v1652_v7 = vcombine.high %v1650_v53, %v1650_v53  ;;  %1658 = vst.msk [vmem:[%s2674_s5 + $0xe] sm:$0x1] %vm546_vm2, %v1650_v53  ;;  %1659 = vst.msk [vmem:[%s2674_s5 + $0x16] sm:$0x1] %vm546_vm2, %v1651_v60 }
 0x1a1   : > { %v1836_v0 = vcombine.high %v1834_v5, %v1834_v5  ;;  %1842 = vst.msk [vmem:[%s2674_s5 + $0xf] sm:$0x1] %vm546_vm2, %v1834_v5  ;;  %1843 = vst.msk [vmem:[%s2674_s5 + $0x17] sm:$0x1] %vm546_vm2, %v1835_v6 }
 0x1a2   : > { %1660 = vst.msk [vmem:[%s2674_s5 + $0x1e] sm:$0x1] %vm546_vm2, %v1652_v7 }
 0x1a3   : > { %1844 = vst.msk [vmem:[%s2674_s5 + $0x1f] sm:$0x1] %vm546_vm2, %v1836_v0 }
 0x1a4   : > { %2366 = shalt.err (!%p2363_p5)
}
 0x1a5   : > { %s2367_s21 = scalar_lea.hbm %s2766_s9, 512  ;;  %s2371_s26 = scalar_lea.hbm %s2830_s4, 1024 }
 0x1a6   : > { %p2368_p6 = scmp.ne.s32.totalorder %s2766_s9, %s2367_s21  ;;  %p2372_p10 = scmp.lt.u32.totalorder %s2766_s9, %s2830_s4 }
 0x1a7   : > { %p2373_p11 = scmp.lt.u32.totalorder %s2371_s26, %s2367_s21  ;;  %p2375_p13 = scmp.lt.u32.totalorder %s2367_s21, %s2766_s9 }
 0x1a8   : > { %p2369_p7 = pnand %p2368_p6, %p2507_p4 }
 0x1a9   : > { %p2374_p12 = por %p2373_p11, %p2372_p10 }
 0x1aa   : > { %p2370_p9 = pneg %p2369_p7 }
 0x1ab   : > { %p2376_p0 = por %p2375_p13, %p2374_p12 }
 0x1ad   : > { %p2377_p1 = pnand %p2376_p0, %p2370_p9 }
 0x1af   : > { %2380 = shalt.err (!%p2377_p1)
}
 0x1b0   : > { %s2440_s5 = smov 128   ;;  %s2441_s6 = smov 8  }
 0x1b1   : > { %2288 = dma.vmem_to_hbm [thread:$0]  (%p2507_p4), %s2768_s7, 512, %s2766_s9, %s2780_s10, %s2440_s5, %s2440_s5, %s2441_s6  }
 0x1b2 PF: > { %p2295_p2 = scmp.ge.s32.totalorder %s2431_s20, 2  ;;  %s1877_s18 = sand.u32 1, %s2411_s15  }
 0x1b3   : > { %s1878_s8 = scalar_lea.sflag [#allocation3], %s1877_s18 }
 0x1b4   : > { %p2291_p3 = pnand %p2295_p2, %p2514_p8 }
 0x1b6   : > { %2406 = dma.done.wait (!%p2291_p3), %s1878_s8, 512  }
 0x1b7   : > { %2408 = vsyncadd (!%p2291_p3), %s1878_s8, 4294966784  ;;  %s17_s20 = sadd.s32 1, %s2431_s20   ;;  %s2833_s15 = smov %s2415_s16 }
 0x1b8   : > { %p14_p5 = scmp.ge.s32.totalorder %s17_s20, 4   ;;  %s2834_s16 = smov %s2419_s17 }
 0x1b9   : > { %s2835_s17 = smov %s2520_s28  ;;  %s2836_s18 = smov %s2427_s19 }
 0x1ba   : > { %s2837_s19 = smov %s2839_s23  ;;  %16 = sbr.rel (!%p14_p5) target bundleno = 4 (0x4), region = 88 }
 0x1c1   :  { %1883 = vsyncpa [#allocation3], 1 }
 0x1c2   :  { %1885 = vsyncpa [#allocation3 + $0x1], 1 }

</bundles_post_ra>
